<compile_context>
chip_gen: v6e
topology: v6e:2x2x1
jax: 0.10.0
libtpu: 0.0.40
codegen_flags: <defaults>
</compile_context>

<pallas_src>
import functools

import jax
import jax.numpy as jnp
from jax.experimental import pallas as pl
from jax.experimental.pallas import tpu as pltpu


def _round_up(x, m):
    return ((x + m - 1) // m) * m


def _pick_tm(B, block_rows):
    # >= 2 batch tiles for moderate B so v7x's two TensorCores both get work;
    # keep the tile a multiple of 8 rows (f32 sublane) and capped at block_rows.
    half = -(-B // 2)
    return max(8, min(block_rows, _round_up(half, 8)))


def _pick_tn(out_p, block_cols):
    # Largest multiple of 128 that divides out_p and is <= block_cols.
    if out_p <= block_cols:
        return out_p
    t = block_cols - (block_cols % 128)
    while t >= 128:
        if out_p % t == 0:
            return t
        t -= 128
    return 128


# ----------------------------------------------------------------------------
# One-time parameter preparation (hoisted out of the per-call wrappers)
# ----------------------------------------------------------------------------
def prepare_style_params(weights, biases, lr_mul=0.1, param_dtype=jnp.bfloat16):
    """Prep StyleVectorizer params once.

    weights: (depth, out_dim, in_dim)  PyTorch EqualLinear layout (square MLP)
    biases:  (depth, out_dim)
    Returns:
      wp: (depth, in_p, out_p) param_dtype  — transposed, padded, lr_mul folded
      bp: (depth, 1, out_p)    float32      — padded, lr_mul folded
    """
    depth, out_dim, in_dim = weights.shape
    in_p = _round_up(in_dim, 128)
    out_p = _round_up(out_dim, 128)
    w = (weights.astype(jnp.float32) * lr_mul).transpose(0, 2, 1)  # (d, in, out)
    wp = jnp.zeros((depth, in_p, out_p), param_dtype)
    wp = wp.at[:, :in_dim, :out_dim].set(w.astype(param_dtype))
    b = biases.astype(jnp.float32) * lr_mul
    bp = jnp.zeros((depth, 1, out_p), jnp.float32).at[:, 0, :out_dim].set(b)
    return wp, bp


def prepare_equal_linear_params(weight, bias, lr_mul=1.0,
                                param_dtype=jnp.bfloat16):
    """weight: (out_dim, in_dim), bias: (out_dim,).
    Returns wp: (in_p, out_p) param_dtype, bp: (1, out_p) float32."""
    out_dim, in_dim = weight.shape
    in_p = _round_up(in_dim, 128)
    out_p = _round_up(out_dim, 128)
    w = (weight.astype(jnp.float32) * lr_mul).T                    # (in, out)
    wp = jnp.zeros((in_p, out_p), param_dtype)
    wp = wp.at[:in_dim, :out_dim].set(w.astype(param_dtype))
    bp = jnp.zeros((1, out_p), jnp.float32)
    bp = bp.at[0, :out_dim].set(bias.astype(jnp.float32) * lr_mul)
    return wp, bp


# ----------------------------------------------------------------------------
# Fused StyleVectorizer:  x = normalize(z);  for l: x = leaky(x @ W_l + b_l)
# (lr_mul already folded into W_l / b_l on the host.)
# ----------------------------------------------------------------------------
def _style_vectorizer_kernel(x_ref, w_ref, b_ref, o_ref, *, depth, alpha, eps):
    x = x_ref[...].astype(jnp.float32)                       # (tm, emb_p)

    # F.normalize(x, dim=1): x / max(||x||_2, eps). Zero-padded feature
    # columns contribute 0 to the norm, so padding is transparent.
    ss = jnp.sum(x * x, axis=-1, keepdims=True)
    x = x / jnp.maximum(jnp.sqrt(ss), eps)

    # Static (small) layer loop — weights resident in VMEM for the whole grid
    # step; activations never leave VMEM between layers.
    for l in range(depth):
        y = jax.lax.dot_general(
            x.astype(w_ref.dtype), w_ref[l],                 # (tm,K) x (K,N)
            dimension_numbers=(((1,), (0,)), ((), ())),
            preferred_element_type=jnp.float32)              # f32 accumulate
        y = y + b_ref[l]
        x = jnp.maximum(y, alpha * y)                        # LeakyReLU(0.2)

    o_ref[...] = x.astype(o_ref.dtype)


def style_vectorizer(z, wp, bp, alpha=0.2, eps=1e-12, block_rows=512):
    """Fused StyleVectorizer forward with pre-prepared params.

    z:  (B, emb) latent codes
    wp: (depth, emb_p, emb_p) prepared weights (see prepare_style_params)
    bp: (depth, 1, emb_p)     prepared biases
    Returns (B, emb) style vectors w.
    """
    B, emb = z.shape
    depth, in_p, out_p = wp.shape

    tm = _pick_tm(B, block_rows)
    Bp = _round_up(B, tm)

    # Skip the activation padding copy entirely when already aligned
    # (the default emb=128, B % tm == 0 case).
    if Bp == B and in_p == emb:
        zp = z
    else:
        zp = jnp.zeros((Bp, in_p), z.dtype).at[:B, :emb].set(z)

    kernel = functools.partial(
        _style_vectorizer_kernel, depth=int(depth), alpha=float(alpha),
        eps=float(eps))

    out = pl.pallas_call(
        kernel,
        out_shape=jax.ShapeDtypeStruct((Bp, out_p), z.dtype),
        grid=(Bp // tm,),
        in_specs=[
            pl.BlockSpec((tm, in_p), lambda i: (i, 0)),               # activations
            pl.BlockSpec((depth, in_p, out_p), lambda i: (0, 0, 0)),  # weights
            pl.BlockSpec((depth, 1, out_p), lambda i: (0, 0, 0)),     # biases
        ],
        out_specs=pl.BlockSpec((tm, out_p), lambda i: (i, 0)),
        compiler_params=pltpu.CompilerParams(
            dimension_semantics=("parallel",)),   # shard batch tiles across TCs
    )(zp, wp, bp)

    return out[:B, :emb]


# ----------------------------------------------------------------------------
# Standalone EqualLinear:  y = x @ (W*lr_mul)^T + b*lr_mul
# (lr_mul folded into the prepared wp / bp.)
# ----------------------------------------------------------------------------
def _equal_linear_kernel(x_ref, w_ref, b_ref, o_ref):
    y = jax.lax.dot_general(
        x_ref[...].astype(w_ref.dtype), w_ref[...],          # (tm,K) x (K,tn)
        dimension_numbers=(((1,), (0,)), ((), ())),
        preferred_element_type=jnp.float32)
    o_ref[...] = (y + b_ref[...]).astype(o_ref.dtype)


def equal_linear(x, wp, bp, out_dim=None, block_rows=512, block_cols=512):
    """x: (B, in_dim); wp: (in_p, out_p); bp: (1, out_p) (prepared params)."""
    B, in_dim = x.shape
    in_p, out_p = wp.shape
    if out_dim is None:
        out_dim = out_p

    tm = _pick_tm(B, block_rows)
    Bp = _round_up(B, tm)
    tn = _pick_tn(out_p, block_cols)         # lane-dense out-feature tiles

    if Bp == B and in_p == in_dim:
        xp = x
    else:
        xp = jnp.zeros((Bp, in_p), x.dtype).at[:B, :in_dim].set(x)

    out = pl.pallas_call(
        _equal_linear_kernel,
        out_shape=jax.ShapeDtypeStruct((Bp, out_p), x.dtype),
        grid=(Bp // tm, out_p // tn),
        in_specs=[
            pl.BlockSpec((tm, in_p), lambda i, j: (i, 0)),
            pl.BlockSpec((in_p, tn), lambda i, j: (0, j)),
            pl.BlockSpec((1, tn), lambda i, j: (0, j)),
        ],
        out_specs=pl.BlockSpec((tm, tn), lambda i, j: (i, j)),
        compiler_params=pltpu.CompilerParams(
            dimension_semantics=("parallel", "parallel")),
    )(xp, wp, bp)

    return out[:B, :out_dim]


if __name__ == "__main__":
    key = jax.random.PRNGKey(0)
    k1, k2, k3, k4, k5, k6 = jax.random.split(key, 6)

    # ---- Fused StyleNet path (SupResStyleGenerator defaults, small batch) ----
    batch, latent_dim, depth, style_lr_mul = 2, 128, 3, 0.1

    z = jax.random.normal(k1, (batch, latent_dim), dtype=jnp.float32)
    style_w = jax.random.normal(k2, (depth, latent_dim, latent_dim),
                                dtype=jnp.float32)
    style_b = 0.1 * jax.random.normal(k3, (depth, latent_dim),
                                      dtype=jnp.float32)

    wp, bp = prepare_style_params(style_w, style_b, lr_mul=style_lr_mul)
    w_styles = style_vectorizer(z, wp, bp)
    jax.block_until_ready(w_styles)

    # Pure-JAX f32 reference of the PyTorch semantics.
    xr = z / jnp.maximum(
        jnp.sqrt(jnp.sum(z * z, axis=1, keepdims=True)), 1e-12)
    for l in range(depth):
        yr = jnp.dot(xr, (style_w[l] * style_lr_mul).T,
                     precision=jax.lax.Precision.HIGHEST) + style_b[l] * style_lr_mul
        xr = jnp.maximum(yr, 0.2 * yr)
    assert w_styles.shape == (batch, latent_dim)
    # bf16 weights / bf16 matmul inputs with f32 accumulation -> looser tol.
    assert jnp.allclose(w_styles, xr, atol=2e-2, rtol=2e-2), float(
        jnp.max(jnp.abs(w_styles - xr)))

    # ---- Standalone EqualLinear ----
    in_dim, out_dim, lm = 128, 64, 0.5
    x = jax.random.normal(k4, (batch, in_dim), dtype=jnp.float32)
    w = jax.random.normal(k5, (out_dim, in_dim), dtype=jnp.float32)
    b = 0.1 * jax.random.normal(k6, (out_dim,), dtype=jnp.float32)

    wq, bq = prepare_equal_linear_params(w, b, lr_mul=lm)
    y = equal_linear(x, wq, bq, out_dim=out_dim)
    jax.block_until_ready(y)

    y_ref = jnp.dot(x, (w * lm).T,
                    precision=jax.lax.Precision.HIGHEST) + b * lm
    assert y.shape == (batch, out_dim)
    assert jnp.allclose(y, y_ref, atol=5e-2, rtol=2e-2), float(
        jnp.max(jnp.abs(y - y_ref)))

    print("KERNEL_OK")
</pallas_src>

<mosaic_0001>
module attributes {stable_mosaic.version = 11 : i64} {
  func.func @_style_vectorizer_kernel(%arg0: i32, %arg1: memref<8x128xf32, #tpu.memory_space<vmem>>, %arg2: memref<3x128x128xbf16, #tpu.memory_space<vmem>>, %arg3: memref<3x1x128xf32, #tpu.memory_space<vmem>>, %arg4: memref<8x128xf32, #tpu.memory_space<vmem>>) attributes {dimension_semantics = [#tpu.dimension_semantics<parallel>], iteration_bounds = array<i64: 1>, scalar_prefetch = 0 : i64, scratch_operands = 0 : i64, tpu.core_type = #tpu.core_type<tc>, window_params = [{transform_indices = @transform_0, window_bounds = array<i64: 8, 128>}, {pipeline_mode = #tpu.pipeline_mode<synchronous>, transform_indices = @transform_1, window_bounds = array<i64: 3, 128, 128>}, {pipeline_mode = #tpu.pipeline_mode<synchronous>, transform_indices = @transform_2, window_bounds = array<i64: 3, 1, 128>}, {transform_indices = @transform_3, window_bounds = array<i64: 8, 128>}]} {
    %c0 = arith.constant 0 : index
    %c0_0 = arith.constant 0 : index
    %0 = vector.load %arg1[%c0, %c0_0] : memref<8x128xf32, #tpu.memory_space<vmem>>, vector<8x128xf32>
    %1 = arith.mulf %0, %0 : vector<8x128xf32>
    %cst = arith.constant dense<0.000000e+00> : vector<8xf32>
    %2 = vector.multi_reduction <add>, %1, %cst [1] : vector<8x128xf32> to vector<8xf32>
    %3 = vector.shape_cast %2 : vector<8xf32> to vector<8x1xf32>
    %4 = math.sqrt %3 : vector<8x1xf32>
    %cst_1 = arith.constant 9.99999996E-13 : f32
    %5 = vector.broadcast %cst_1 : f32 to vector<8x1xf32>
    %6 = arith.maximumf %4, %5 : vector<8x1xf32>
    %7 = vector.broadcast %6 : vector<8x1xf32> to vector<8x128xf32>
    %8 = arith.divf %0, %7 : vector<8x128xf32>
    %9 = arith.truncf %8 : vector<8x128xf32> to vector<8x128xbf16>
    %c0_2 = arith.constant 0 : index
    %c0_3 = arith.constant 0 : index
    %c0_4 = arith.constant 0 : index
    %10 = vector.load %arg2[%c0_2, %c0_3, %c0_4] : memref<3x128x128xbf16, #tpu.memory_space<vmem>>, vector<1x128x128xbf16>
    %11 = vector.shape_cast %10 : vector<1x128x128xbf16> to vector<128x128xbf16>
    %cst_5 = arith.constant dense<0.000000e+00> : vector<8x128xf32>
    %12 = tpu.matmul %9, %11, %cst_5 {dimension_numbers = #tpu.dot_dimension_numbers<[1], [0], [0], [1], [0, 0, 1, 1], [], []>} : vector<8x128xbf16>, vector<128x128xbf16>, vector<8x128xf32> -> vector<8x128xf32>
    %c0_6 = arith.constant 0 : index
    %c0_7 = arith.constant 0 : index
    %c0_8 = arith.constant 0 : index
    %13 = vector.load %arg3[%c0_6, %c0_7, %c0_8] : memref<3x1x128xf32, #tpu.memory_space<vmem>>, vector<1x1x128xf32>
    %14 = vector.shape_cast %13 : vector<1x1x128xf32> to vector<1x128xf32>
    %15 = vector.broadcast %14 : vector<1x128xf32> to vector<8x128xf32>
    %16 = arith.addf %12, %15 : vector<8x128xf32>
    %cst_9 = arith.constant 2.000000e-01 : f32
    %17 = vector.broadcast %cst_9 : f32 to vector<8x128xf32>
    %18 = arith.mulf %17, %16 : vector<8x128xf32>
    %19 = arith.maximumf %16, %18 : vector<8x128xf32>
    %20 = arith.truncf %19 : vector<8x128xf32> to vector<8x128xbf16>
    %c1 = arith.constant 1 : index
    %c0_10 = arith.constant 0 : index
    %c0_11 = arith.constant 0 : index
    %21 = vector.load %arg2[%c1, %c0_10, %c0_11] : memref<3x128x128xbf16, #tpu.memory_space<vmem>>, vector<1x128x128xbf16>
    %22 = vector.shape_cast %21 : vector<1x128x128xbf16> to vector<128x128xbf16>
    %cst_12 = arith.constant dense<0.000000e+00> : vector<8x128xf32>
    %23 = tpu.matmul %20, %22, %cst_12 {dimension_numbers = #tpu.dot_dimension_numbers<[1], [0], [0], [1], [0, 0, 1, 1], [], []>} : vector<8x128xbf16>, vector<128x128xbf16>, vector<8x128xf32> -> vector<8x128xf32>
    %c1_13 = arith.constant 1 : index
    %c0_14 = arith.constant 0 : index
    %c0_15 = arith.constant 0 : index
    %24 = vector.load %arg3[%c1_13, %c0_14, %c0_15] : memref<3x1x128xf32, #tpu.memory_space<vmem>>, vector<1x1x128xf32>
    %25 = vector.shape_cast %24 : vector<1x1x128xf32> to vector<1x128xf32>
    %26 = vector.broadcast %25 : vector<1x128xf32> to vector<8x128xf32>
    %27 = arith.addf %23, %26 : vector<8x128xf32>
    %cst_16 = arith.constant 2.000000e-01 : f32
    %28 = vector.broadcast %cst_16 : f32 to vector<8x128xf32>
    %29 = arith.mulf %28, %27 : vector<8x128xf32>
    %30 = arith.maximumf %27, %29 : vector<8x128xf32>
    %31 = arith.truncf %30 : vector<8x128xf32> to vector<8x128xbf16>
    %c2 = arith.constant 2 : index
    %c0_17 = arith.constant 0 : index
    %c0_18 = arith.constant 0 : index
    %32 = vector.load %arg2[%c2, %c0_17, %c0_18] : memref<3x128x128xbf16, #tpu.memory_space<vmem>>, vector<1x128x128xbf16>
    %33 = vector.shape_cast %32 : vector<1x128x128xbf16> to vector<128x128xbf16>
    %cst_19 = arith.constant dense<0.000000e+00> : vector<8x128xf32>
    %34 = tpu.matmul %31, %33, %cst_19 {dimension_numbers = #tpu.dot_dimension_numbers<[1], [0], [0], [1], [0, 0, 1, 1], [], []>} : vector<8x128xbf16>, vector<128x128xbf16>, vector<8x128xf32> -> vector<8x128xf32>
    %c2_20 = arith.constant 2 : index
    %c0_21 = arith.constant 0 : index
    %c0_22 = arith.constant 0 : index
    %35 = vector.load %arg3[%c2_20, %c0_21, %c0_22] : memref<3x1x128xf32, #tpu.memory_space<vmem>>, vector<1x1x128xf32>
    %36 = vector.shape_cast %35 : vector<1x1x128xf32> to vector<1x128xf32>
    %37 = vector.broadcast %36 : vector<1x128xf32> to vector<8x128xf32>
    %38 = arith.addf %34, %37 : vector<8x128xf32>
    %cst_23 = arith.constant 2.000000e-01 : f32
    %39 = vector.broadcast %cst_23 : f32 to vector<8x128xf32>
    %40 = arith.mulf %39, %38 : vector<8x128xf32>
    %41 = arith.maximumf %38, %40 : vector<8x128xf32>
    %c0_24 = arith.constant 0 : index
    %c0_25 = arith.constant 0 : index
    %42 = vector.load %arg4[%c0_24, %c0_25] : memref<8x128xf32, #tpu.memory_space<vmem>>, vector<8x128xf32>
    tpu.vector_store %arg4[%c0_24, %c0_25], %41 {strides = array<i32>} : memref<8x128xf32, #tpu.memory_space<vmem>>, vector<8x128xf32>,
    return
  }
  func.func @transform_0(%arg0: i32) -> (i32, i32) {
    %c0_i32 = arith.constant 0 : i32
    %c0_i32_0 = arith.constant 0 : i32
    return %arg0, %c0_i32 : i32, i32
  }
  func.func @transform_1(%arg0: i32) -> (i32, i32, i32) {
    %c0_i32 = arith.constant 0 : i32
    %c0_i32_0 = arith.constant 0 : i32
    %c0_i32_1 = arith.constant 0 : i32
    %c0_i32_2 = arith.constant 0 : i32
    return %c0_i32, %c0_i32_0, %c0_i32_1 : i32, i32, i32
  }
  func.func @transform_2(%arg0: i32) -> (i32, i32, i32) {
    %c0_i32 = arith.constant 0 : i32
    %c0_i32_0 = arith.constant 0 : i32
    %c0_i32_1 = arith.constant 0 : i32
    %c0_i32_2 = arith.constant 0 : i32
    return %c0_i32, %c0_i32_0, %c0_i32_1 : i32, i32, i32
  }
  func.func @transform_3(%arg0: i32) -> (i32, i32) {
    %c0_i32 = arith.constant 0 : i32
    %c0_i32_0 = arith.constant 0 : i32
    return %arg0, %c0_i32 : i32, i32
  }
}

</mosaic_0001>

<bundles_post_ra>
// kernel: tpu_custom_call.1
= control target key start
LH: loop header
LB: loop body
LE: loop exit
PB: predicated region body
PF: predicated region fallthrough
CT: control target
= control target key end

     0   :  { %8 = vsyncpa [#allocation3], 0  ;;  %s716_s0 = inlined_call_operand.hbm [shape: f32[8,128], index: 0, kind: input, shape index: {}]   ;;  %s717_s1 = inlined_call_operand.hbm [shape: bf16[3,128,128], index: 1, kind: input, shape index: {}]   ;;  %s718_s2 = inlined_call_operand.vmem [shape: f32[3,1,128], index: 2, kind: input, shape index: {}]   ;;  %s719_s3 = inlined_call_operand.hbm [shape: f32[8,128], index: 3, kind: output, shape index: {}]  }
   0x1   :  { %9 = vsyncpa [#allocation6], 0 }
   0x2   :  { %10 = vsyncpa [#allocation4], 0  ;;  %s636_s12 = smov [#allocation2]   ;;  %s637_s14 = smov [#allocation5]  }
   0x3   :  { %s17_s13 = sshll.u32 %s636_s12, 4  ;;  %s26_s15 = sshll.u32 %s637_s14, 4  ;;  %s18_s13 = int_to_ptr.vmem [resolvable:$true] %s17_s13  ;;  %s27_s15 = int_to_ptr.vmem [resolvable:$true] %s26_s15 }
   0x4   :  { %s578_s16 = scalar_lea.vmem %s18_s13, 128  ;;  %p583_p1 = scmp.lt.s32.totalorder %s18_s13, %s18_s13 }
   0x5   :  { %p579_p0 = scmp.ne.s32.totalorder %s18_s13, %s578_s16  ;;  %p584_p2 = scmp.lt.s32.totalorder %s578_s16, %s578_s16 }
   0x7   :  { %p585_p3 = por %p584_p2, %p583_p1 }
   0x9   :  { %p586_p4 = pnand %p585_p3, %p579_p0 }
   0xb   :  { %589 = shalt.err (!%p586_p4)
}
   0xc   :  { %20 = dma.hbm_to_vmem [thread:$0]  %s716_s0, 128, %s18_s13, [#allocation3]  }
   0xd   :  { %s598_s19 = scalar_lea.vmem %s27_s15, 3072  ;;  %p603_p6 = scmp.lt.s32.totalorder %s27_s15, %s27_s15 }
   0xe   :  { %p599_p5 = scmp.ne.s32.totalorder %s27_s15, %s598_s19  ;;  %p604_p7 = scmp.lt.s32.totalorder %s598_s19, %s598_s19 }
  0x10   :  { %p605_p8 = por %p604_p7, %p603_p6 }
  0x12   :  { %p606_p9 = pnand %p605_p8, %p599_p5 }
  0x14   :  { %609 = shalt.err (!%p606_p9)
}
  0x15   :  { %s638_s20 = smov 64   ;;  %s639_s21 = smov 4  }
  0x16   :  { %32 = dma.hbm_to_vmem [thread:$0]  %s717_s1, 3072, %s27_s15, [#allocation6], %s638_s20, %s638_s20, %s639_s21  }
  0x17   :  { %630 = dma.done.wait [#allocation3], 128  }
  0x18   :  { %631 = vsyncadd [#allocation3], 4294967168 }
  0x19   :  { %632 = dma.done.wait [#allocation6], 3072  }
  0x1a   :  { %633 = vsyncadd [#allocation6], 4294964224  ;;  %v669_v0 = vld [vmem:[#allocation2] sm:$0xff]  ;;  %v640_v3 = vmov 0.0   ;;  %v543_v4 = vld [vmem:[#allocation5 + $0x30] sm:$0xff]   ;;  %vm641_vm0 = vmmov 0  }
  0x1b   :  { %v43_v1 = vmul.f32 %v669_v0, %v669_v0  ;;  %v542_v2 = vld [vmem:[#allocation5 + $0x38] sm:$0xff]   ;;  %475 = vmatprep.subr.bf16.mxu0 %v640_v3  ;;  %495 = vmatprep.subr.bf16.mxu1 %v640_v3  ;;  %v544_v5 = vld [vmem:[#allocation5 + $0x28] sm:$0xff]   ;;  %v545_v6 = vld [vmem:[#allocation5 + $0x20] sm:$0xff]   ;;  %s642_s28 = smov [#allocation7]  }
  0x1c   :  { %476 = vmatpush3.bf16.msra.mxu0 %v542_v2  ;;  %v546_v7 = vld [vmem:[#allocation5 + $0x18] sm:$0xff]   ;;  %491 = vmatprep.mubr.msk.bf16.mxu0 %vm641_vm0, %v640_v3  ;;  %v547_v8 = vld [vmem:[#allocation5 + $0x10] sm:$0xff]   ;;  %v548_v9 = vld [vmem:[#allocation5 + $0x8] sm:$0xff]   ;;  %s409_s29 = sshll.u32 %s642_s28, 4  ;;  %s410_s29 = int_to_ptr.vmem [resolvable:$true] %s409_s29 }
  0x1d   :  { %44 = vadd.xlane.f32.xlu0 %v43_v1  ;;  %477 = vmatprep.subr.bf16.mxu0 %v640_v3  ;;  %v549_v10 = vld [vmem:[#allocation5] sm:$0xff]   ;;  %v550_v11 = vld [vmem:[#allocation5 + $0x78] sm:$0xff]   ;;  %v551_v12 = vld [vmem:[#allocation5 + $0x70] sm:$0xff]   ;;  %s610_s30 = scalar_lea.vmem %s410_s29, 128  ;;  %p615_p11 = scmp.lt.s32.totalorder %s410_s29, %s410_s29 }
  0x1e   :  { %511 = vmatprep.mubr.msk.bf16.mxu1 %vm641_vm0, %v640_v3  ;;  %496 = vmatpush3.bf16.msra.mxu1 %v550_v11  ;;  %v552_v13 = vld [vmem:[#allocation5 + $0x68] sm:$0xff]   ;;  %v553_v14 = vld [vmem:[#allocation5 + $0x60] sm:$0xff]   ;;  %v554_v15 = vld [vmem:[#allocation5 + $0x58] sm:$0xff]   ;;  %p611_p10 = scmp.ne.s32.totalorder %s410_s29, %s610_s30  ;;  %p616_p12 = scmp.lt.s32.totalorder %s610_s30, %s610_s30 }
  0x1f   :  { %497 = vmatprep.subr.bf16.mxu1 %v640_v3  ;;  %v555_v16 = vld [vmem:[#allocation5 + $0x50] sm:$0xff]   ;;  %v556_v27 = vld [vmem:[#allocation5 + $0x48] sm:$0xff]   ;;  %v557_v28 = vld [vmem:[#allocation5 + $0x40] sm:$0xff]  }
  0x20   :  { %478 = vmatpush3.bf16.msra.mxu0 %v543_v4  ;;  %v558_v29 = vld [vmem:[#allocation5 + $0xb8] sm:$0xff]   ;;  %v559_v30 = vld [vmem:[#allocation5 + $0xb0] sm:$0xff]   ;;  %v560_v31 = vld [vmem:[#allocation5 + $0xa8] sm:$0xff]   ;;  %p617_p13 = por %p616_p12, %p615_p11 }
  0x21   :  { %479 = vmatprep.subr.bf16.mxu0 %v640_v3  ;;  %v561_v32 = vld [vmem:[#allocation5 + $0xa0] sm:$0xff]   ;;  %v562_v33 = vld [vmem:[#allocation5 + $0x98] sm:$0xff]   ;;  %v563_v34 = vld [vmem:[#allocation5 + $0x90] sm:$0xff]  }
  0x22   :  { %498 = vmatpush3.bf16.msra.mxu1 %v551_v12  ;;  %v419_v35 = vld [vmem:[%s718_s2] ss:$0 sm:$0xff]  ;;  %v564_v44 = vld [vmem:[#allocation5 + $0x88] sm:$0xff]   ;;  %v565_v45 = vld [vmem:[#allocation5 + $0x80] sm:$0xff]   ;;  %p618_p0 = pnand %p617_p13, %p611_p10 }
  0x23   :  { %499 = vmatprep.subr.bf16.mxu1 %v640_v3  ;;  %v429_v46 = vld [vmem:[%s718_s2 + $0x1] ss:$0 sm:$0xff]  ;;  %v439_v55 = vld [vmem:[%s718_s2 + $0x2] ss:$0 sm:$0xff] }
  0x24   :  { %480 = vmatpush3.bf16.msra.mxu0 %v544_v5 }
  0x25   :  { %481 = vmatprep.subr.bf16.mxu0 %v640_v3 }
  0x26   :  { %500 = vmatpush3.bf16.msra.mxu1 %v552_v13 }
  0x27   :  { %501 = vmatprep.subr.bf16.mxu1 %v640_v3 }
  0x28   :  { %482 = vmatpush3.bf16.msra.mxu0 %v545_v6 }
  0x29   :  { %483 = vmatprep.subr.bf16.mxu0 %v640_v3 }
  0x2a   :  { %502 = vmatpush3.bf16.msra.mxu1 %v553_v14 }
  0x2b   :  { %503 = vmatprep.subr.bf16.mxu1 %v640_v3 }
  0x2c   :  { %484 = vmatpush3.bf16.msra.mxu0 %v546_v7 }
  0x2d   :  { %485 = vmatprep.subr.bf16.mxu0 %v640_v3 }
  0x2e   :  { %504 = vmatpush3.bf16.msra.mxu1 %v554_v15 }
  0x2f   :  { %505 = vmatprep.subr.bf16.mxu1 %v640_v3 }
  0x30   :  { %486 = vmatpush3.bf16.msra.mxu0 %v547_v8 }
  0x31   :  { %487 = vmatprep.subr.bf16.mxu0 %v640_v3 }
  0x32   :  { %506 = vmatpush3.bf16.msra.mxu1 %v555_v16 }
  0x33   :  { %507 = vmatprep.subr.bf16.mxu1 %v640_v3 }
  0x34   :  { %488 = vmatpush3.bf16.msra.mxu0 %v548_v9 }
  0x35   :  { %489 = vmatprep.subr.bf16.mxu0 %v640_v3 }
  0x36   :  { %508 = vmatpush3.bf16.msra.mxu1 %v556_v27 }
  0x37   :  { %509 = vmatprep.subr.bf16.mxu1 %v640_v3 }
  0x38   :  { %490 = vmatpush3.bf16.msra.mxu0 %v549_v10 }
  0x39   :  { %515 = vmatprep.subr.bf16.mxu0 %v640_v3 }
  0x3a   :  { %510 = vmatpush3.bf16.msra.mxu1 %v557_v28 }
  0xa6   :  { %v45_v17 = vpop.xlane.xlu0 %44 }
  0xa7   :  { %566 = vrsqrt.f32 %v45_v17  ;;  %vm48_vm1 = vcmp.eq.f32.partialorder %v45_v17, inf  ;;  %v51_v20 = vand.u32 2147483648, %v45_v17  ;;  %vm50_vm2 = vcmp.eq.f32.partialorder %v45_v17, 0.0 }
  0xb4   :  { %v567_v18 = vpop.eup %566 }
  0xb5   :  { %v47_v19 = vmul.f32 %v567_v18, %v45_v17 }
  0xb7   :  { %v49_v21 = vsel %vm48_vm1, %v45_v17, %v47_v19 }
  0xb8   :  { %v52_v22 = vsel %vm50_vm2, %v51_v20, %v49_v21 }
  0xb9   :  { %v53_v23 = vmax.f32 %v52_v22, 1e-12 }
  0xbb   :  { %568 = vrcp.f32 %v53_v23 }
  0xc8   :  { %v569_v24 = vpop.eup %568 }
  0xc9   :  { %v55_v25 = vmul.f32 %v569_v24, %v669_v0 }
  0xcb   :  { %v56_v26 = vpack.c.bf16 %v55_v25, %v55_v25 }
  0xcd   :  { %492 = vmatmul.mubr.bf16.vlgmr.msra.gmra.mxu0 %v56_v26 }
  0xce   :  { %531 = vmatprep.mubr.msk.bf16.mxu0 %vm641_vm0, %v640_v3  ;;  %516 = vmatpush3.bf16.msra.mxu0 %v558_v29 }
  0xcf   :  { %517 = vmatprep.subr.bf16.mxu0 %v640_v3 }
  0xd2   :  { %518 = vmatpush3.bf16.msra.mxu0 %v559_v30 }
  0xd3   :  { %519 = vmatprep.subr.bf16.mxu0 %v640_v3 }
  0xd6   :  { %520 = vmatpush3.bf16.msra.mxu0 %v560_v31 }
  0xd7   :  { %521 = vmatprep.subr.bf16.mxu0 %v640_v3 }
  0xda   :  { %522 = vmatpush3.bf16.msra.mxu0 %v561_v32 }
  0xdb   :  { %523 = vmatprep.subr.bf16.mxu0 %v640_v3 }
  0xde   :  { %524 = vmatpush3.bf16.msra.mxu0 %v562_v33 }
  0xdf   :  { %525 = vmatprep.subr.bf16.mxu0 %v640_v3 }
  0xe2   :  { %526 = vmatpush3.bf16.msra.mxu0 %v563_v34 }
  0xe3   :  { %527 = vmatprep.subr.bf16.mxu0 %v640_v3 }
  0xe6   :  { %528 = vmatpush3.bf16.msra.mxu0 %v564_v44 }
  0xe7   :  { %529 = vmatprep.subr.bf16.mxu0 %v640_v3 }
  0xea   :  { %530 = vmatpush3.bf16.msra.mxu0 %v565_v45 }
 0x18d   :  { %v162_v36 = vpop.f32.mrf.mxu0 }
 0x18e   :  { %v163_v37 = vadd.f32 %v419_v35, %v162_v36 }
 0x18f   :  { %v493_v38 = vpop.f32.mrf.mxu0 }
 0x190   :  { %v168_v39 = vmul.f32 0.2, %v163_v37 }
 0x191   :  { %v165_v40 = vpop.f32.mrf.mxu0 }
 0x192   :  { %v169_v41 = vmax.f32 %v163_v37, %v168_v39 }
 0x193   :  { %v494_v42 = vpop.f32.mrf.mxu0 }
 0x194   :  { %v170_v43 = vpack.c.bf16 %v169_v41, %v169_v41 }
 0x196   :  { %512 = vmatmul.mubr.bf16.vlgmr.msra.gmra.mxu1 %v170_v43 }
 0x256   :  { %v278_v47 = vpop.f32.mrf.mxu1 }
 0x257   :  { %v279_v48 = vadd.f32 %v429_v46, %v278_v47 }
 0x258   :  { %v513_v49 = vpop.f32.mrf.mxu1 }
 0x259   :  { %v284_v50 = vmul.f32 0.2, %v279_v48 }
 0x25a   :  { %v281_v51 = vpop.f32.mrf.mxu1 }
 0x25b   :  { %v285_v52 = vmax.f32 %v279_v48, %v284_v50 }
 0x25c   :  { %v514_v53 = vpop.f32.mrf.mxu1 }
 0x25d   :  { %v286_v54 = vpack.c.bf16 %v285_v52, %v285_v52 }
 0x25f   :  { %532 = vmatmul.mubr.bf16.vlgmr.msra.gmra.mxu0 %v286_v54 }
 0x31f   :  { %v394_v56 = vpop.f32.mrf.mxu0 }
 0x320   :  { %v395_v57 = vadd.f32 %v439_v55, %v394_v56 }
 0x321   :  { %v533_v58 = vpop.f32.mrf.mxu0 }
 0x322   :  { %v400_v59 = vmul.f32 0.2, %v395_v57 }
 0x323   :  { %v397_v60 = vpop.f32.mrf.mxu0 }
 0x324   :  { %v401_v61 = vmax.f32 %v395_v57, %v400_v59 }
 0x325   :  { %v534_v62 = vpop.f32.mrf.mxu0 }
 0x326   :  { %402 = vst [vmem:[#allocation7] sm:$0xff] %v401_v61 }
 0x327   :  { %621 = shalt.err (!%p618_p0)
}
 0x328   :  { %412 = dma.vmem_to_hbm [thread:$0]  %s410_s29, 128, %s719_s3, [#allocation4]  }
 0x329   :  { %634 = dma.done.wait [#allocation4], 128  }
 0x32a   :  { %635 = vsyncadd [#allocation4], 4294967168 }
 0x32b   :  { %416 = vsyncpa [#allocation3], 1 }
 0x32c   :  { %417 = vsyncpa [#allocation6], 1 }
 0x32d   :  { %418 = vsyncpa [#allocation4], 1 }

</bundles_post_ra>
